<compile_context>
chip_gen: v7x
topology: tpu7x:2x2x1
jax: 0.10.0
libtpu: 0.0.40
codegen_flags: <defaults>
</compile_context>

<pallas_src>
from functools import partial

import jax
import jax.numpy as jnp
import numpy as np
from jax.experimental import pallas as pl
from jax.experimental.pallas import tpu as pltpu  # noqa: F401  (TPU backend assumed)


def _rnd8(n):
    return ((n + 7) // 8) * 8


def make_gcn_kernel(TM, Fin, H, O, r_w1, r_b1, r_w2, r_b2, r_wf):
    """Single-invocation kernel: all T timesteps as one block-diagonal graph.

    a_prep_ref : (TM, TM)  binarized block-diag of per-timestep A^T, + I (prebuilt).
    x_ref      : (TM, Fin) time-major flattened node features.
    slab_ref   : (rows, H) packed parameters (w1, b1, w2, b2, wf^T), 8-row aligned.
    bf_t_ref   : (O, 1)    final-layer bias (transposed).
    out_ref    : (O, TM)   transposed output -> lane-dense store.
    """

    def kernel(mask_row_ref, a_prep_ref, x_ref, slab_ref, bf_t_ref, out_ref):
        mr = mask_row_ref[...]                        # (1, TM) float node mask

        # Single elementwise pass: column-mask the prebuilt (binarized + self
        # loop) block-diagonal adjacency.  Target-row masking is redundant:
        # masked source columns are zero, so garbage rows never feed kept rows
        # and are zeroed by the final * mr.
        Bm = a_prep_ref[...] * mr                     # (TM, TM)

        # GCN symmetric normalization.  Row-reduce -> XLU, rsqrt -> EUP: both
        # use otherwise-idle VLIW slots, so keep them in-kernel.
        deg = jnp.sum(Bm, axis=1, keepdims=True)      # (TM, 1)
        s = jnp.where(deg > 0.0, jax.lax.rsqrt(deg), 0.0)

        # Static, 8-row-aligned slices of the packed parameter slab.
        w1 = slab_ref[r_w1:r_w1 + Fin, :]             # (Fin, H)
        b1 = slab_ref[r_b1:r_b1 + 1, :]               # (1, H)
        w2 = slab_ref[r_w2:r_w2 + H, :]               # (H, H)
        b2 = slab_ref[r_b2:r_b2 + 1, :]               # (1, H)
        wf_t = slab_ref[r_wf:r_wf + O, :]             # (O, H)

        def gcn_layer(h, w, b):
            z = jnp.dot(h, w, preferred_element_type=jnp.float32)        # X W
            z = jnp.dot(Bm, z * s, preferred_element_type=jnp.float32)   # aggregate
            return jnp.maximum(z * s + b, 0.0)                           # norm+bias+relu

        h1 = gcn_layer(x_ref[...], w1, b1)
        h2 = gcn_layer(h1, w2, b2)

        # Final FC computed transposed: (O,H) x (TM,H)^T -> (O, TM), lane-dense.
        out_t = jnp.einsum('ok,rk->or', wf_t, h2,
                           preferred_element_type=jnp.float32)
        out_ref[...] = ((out_t + bf_t_ref[...]) * mr).astype(out_ref.dtype)

    return kernel


@partial(jax.jit, static_argnames=("B", "N"))
def gcn_only_forward(x, A, mask, params, *, B, N):
    """Pallas implementation of GCNOnly.forward. Returns (B, N, T, output_dim)."""
    T, M, Fin = x.shape
    H = params['w1'].shape[1]
    O = params['wf'].shape[1]
    TM = T * M
    f32 = jnp.float32

    mask_row = mask.astype(f32).reshape(1, TM)

    # --- Adjacency prep hoisted out of the kernel (fuses with A_bd assembly) ---
    # PyG GCNConv aggregates source->target => A^T; binarize, lay out as one
    # (T*M, T*M) block-diagonal, and add self loops once.  Masking of self
    # loops/sources happens in-kernel via the single `* mask_row`.
    A_bin_t = (jnp.transpose(A, (0, 2, 1)) != 0).astype(f32)         # (T, M, M)
    eye_T = jnp.eye(T, dtype=f32)
    A_bd = (eye_T[:, None, :, None] * A_bin_t[:, :, None, :]).reshape(TM, TM)
    A_prep = A_bd + jnp.eye(TM, dtype=f32)                           # entries {0,1,2}

    x_flat = x.astype(f32).reshape(TM, Fin)

    # --- Pack the small parameters into one 8-row-aligned slab (fewer DMAs) ---
    r_w1 = 0
    r_b1 = _rnd8(Fin)
    r_w2 = r_b1 + 8
    r_b2 = r_w2 + _rnd8(H)
    r_wf = r_b2 + 8
    n_rows = r_wf + _rnd8(O)

    slab = jnp.zeros((n_rows, H), f32)
    slab = slab.at[r_w1:r_w1 + Fin, :].set(params['w1'].astype(f32))
    slab = slab.at[r_b1:r_b1 + 1, :].set(params['b1'].astype(f32).reshape(1, H))
    slab = slab.at[r_w2:r_w2 + H, :].set(params['w2'].astype(f32))
    slab = slab.at[r_b2:r_b2 + 1, :].set(params['b2'].astype(f32).reshape(1, H))
    slab = slab.at[r_wf:r_wf + O, :].set(jnp.transpose(params['wf']).astype(f32))
    bf_t = params['bf'].astype(f32).reshape(O, 1)

    kernel = make_gcn_kernel(TM, Fin, H, O, r_w1, r_b1, r_w2, r_b2, r_wf)
    out_t = pl.pallas_call(
        kernel,
        out_shape=jax.ShapeDtypeStruct((O, TM), f32),
    )(mask_row, A_prep, x_flat, slab, bf_t)

    # (O, T*M) -> (T*M, O) -> (T, B, N, O) -> (B, N, T, O)  (torch permute(1,2,0,3))
    return jnp.transpose(out_t).reshape(T, B, N, O).transpose(1, 2, 0, 3)


def reference_forward(x, A, mask, params, *, B, N):
    """Pure-JAX reference with identical masked-GCN semantics."""
    T, M, _ = x.shape
    O = params['wf'].shape[1]
    outs = []
    for t in range(T):
        m = mask[t].astype(jnp.float32)
        adj = (A[t] != 0).astype(jnp.float32) * m[:, None] * m[None, :]
        Bm = adj.T + jnp.diag(m)
        deg = Bm.sum(axis=1)
        s = jnp.where(deg > 0, 1.0 / jnp.sqrt(deg), 0.0)
        A_hat = s[:, None] * Bm * s[None, :]
        h1 = jax.nn.relu(A_hat @ (x[t] @ params['w1']) + params['b1'])
        h2 = jax.nn.relu(A_hat @ (h1 @ params['w2']) + params['b2'])
        o = (h2 @ params['wf'] + params['bf']) * m[:, None]
        outs.append(o)
    out = jnp.stack(outs, axis=0).reshape(T, B, N, O).transpose(1, 2, 0, 3)
    return out


if __name__ == "__main__":
    # Small config consistent with the module: B=2, N=8 nodes, T=8 timesteps,
    # input_dim=4, hidden_dim=32, output_dim=8  =>  T*M = 128.
    B_, N_, T_ = 2, 8, 8
    input_dim, hidden_dim, output_dim = 4, 32, 8
    M_ = B_ * N_

    key = jax.random.PRNGKey(0)
    k0, k1, k2, k3, k4, k5 = jax.random.split(key, 6)

    x = jax.random.normal(k0, (T_, M_, input_dim), dtype=jnp.float32)
    A = (jax.random.uniform(k1, (T_, M_, M_)) > 0.7).astype(jnp.float32)
    mask = (jax.random.uniform(k2, (T_, M_)) > 0.3)

    params = {
        'w1': 0.1 * jax.random.normal(k3, (input_dim, hidden_dim), dtype=jnp.float32),
        'b1': 0.01 * jnp.ones((1, hidden_dim), jnp.float32),
        'w2': 0.1 * jax.random.normal(k4, (hidden_dim, hidden_dim), dtype=jnp.float32),
        'b2': 0.01 * jnp.ones((1, hidden_dim), jnp.float32),
        'wf': 0.1 * jax.random.normal(k5, (hidden_dim, output_dim), dtype=jnp.float32),
        'bf': 0.01 * jnp.ones((1, output_dim), jnp.float32),
    }
    # TODO(synk): pos_embed sinusoidal buffer is registered in BaseModel but unused
    # in GCNOnly.forward, so it is intentionally omitted.

    out = jax.block_until_ready(gcn_only_forward(x, A, mask, params, B=B_, N=N_))
    ref = reference_forward(x, A, mask, params, B=B_, N=N_)
    np.testing.assert_allclose(np.asarray(out), np.asarray(ref), rtol=1e-4, atol=1e-4)
    print("KERNEL_OK")
</pallas_src>

<mosaic_0001>
module attributes {stable_mosaic.version = 11 : i64} {
  func.func @kernel(%arg0: memref<1x128xf32, #tpu.memory_space<vmem>>, %arg1: memref<128x128xf32, #tpu.memory_space<vmem>>, %arg2: memref<128x4xf32, #tpu.memory_space<vmem>>, %arg3: memref<64x32xf32, #tpu.memory_space<vmem>>, %arg4: memref<8x1xf32, #tpu.memory_space<vmem>>, %arg5: memref<8x128xf32, #tpu.memory_space<vmem>>) attributes {dimension_semantics = [], scalar_prefetch = 0 : i64, scratch_operands = 0 : i64, tpu.core_type = #tpu.core_type<tc>} {
    %c0 = arith.constant 0 : index
    %c0_0 = arith.constant 0 : index
    %0 = vector.load %arg0[%c0, %c0_0] : memref<1x128xf32, #tpu.memory_space<vmem>>, vector<1x128xf32>
    %c0_1 = arith.constant 0 : index
    %c0_2 = arith.constant 0 : index
    %1 = vector.load %arg1[%c0_1, %c0_2] : memref<128x128xf32, #tpu.memory_space<vmem>>, vector<128x128xf32>
    %2 = vector.broadcast %0 : vector<1x128xf32> to vector<128x128xf32>
    %3 = arith.mulf %1, %2 : vector<128x128xf32>
    %cst = arith.constant dense<0.000000e+00> : vector<128xf32>
    %4 = vector.multi_reduction <add>, %3, %cst [1] : vector<128x128xf32> to vector<128xf32>
    %5 = vector.shape_cast %4 : vector<128xf32> to vector<128x1xf32>
    %cst_3 = arith.constant 0.000000e+00 : f32
    %6 = vector.broadcast %cst_3 : f32 to vector<128x1xf32>
    %7 = arith.cmpf ogt, %5, %6 : vector<128x1xf32>
    %8 = math.rsqrt %5 : vector<128x1xf32>
    %cst_4 = arith.constant 0.000000e+00 : f32
    %9 = vector.broadcast %cst_4 : f32 to vector<128x1xf32>
    %10 = arith.select %7, %8, %9 : vector<128x1xi1>, vector<128x1xf32>
    %c0_5 = arith.constant 0 : index
    %c0_6 = arith.constant 0 : index
    %11 = vector.load %arg3[%c0_5, %c0_6] : memref<64x32xf32, #tpu.memory_space<vmem>>, vector<4x32xf32>
    %c8 = arith.constant 8 : index
    %c0_7 = arith.constant 0 : index
    %12 = vector.load %arg3[%c8, %c0_7] : memref<64x32xf32, #tpu.memory_space<vmem>>, vector<1x32xf32>
    %c16 = arith.constant 16 : index
    %c0_8 = arith.constant 0 : index
    %13 = vector.load %arg3[%c16, %c0_8] : memref<64x32xf32, #tpu.memory_space<vmem>>, vector<32x32xf32>
    %c48 = arith.constant 48 : index
    %c0_9 = arith.constant 0 : index
    %14 = vector.load %arg3[%c48, %c0_9] : memref<64x32xf32, #tpu.memory_space<vmem>>, vector<1x32xf32>
    %c56 = arith.constant 56 : index
    %c0_10 = arith.constant 0 : index
    %15 = vector.load %arg3[%c56, %c0_10] : memref<64x32xf32, #tpu.memory_space<vmem>>, vector<8x32xf32>
    %c0_11 = arith.constant 0 : index
    %c0_12 = arith.constant 0 : index
    %16 = vector.load %arg2[%c0_11, %c0_12] : memref<128x4xf32, #tpu.memory_space<vmem>>, vector<128x4xf32>
    %cst_13 = arith.constant dense<0.000000e+00> : vector<128x32xf32>
    %17 = tpu.matmul %16, %11, %cst_13 {dimension_numbers = #tpu.dot_dimension_numbers<[1], [0], [0], [1], [0, 0, 1, 1], [], []>} : vector<128x4xf32>, vector<4x32xf32>, vector<128x32xf32> -> vector<128x32xf32>
    %18 = vector.broadcast %10 : vector<128x1xf32> to vector<128x32xf32>
    %19 = arith.mulf %17, %18 : vector<128x32xf32>
    %cst_14 = arith.constant dense<0.000000e+00> : vector<128x32xf32>
    %20 = tpu.matmul %3, %19, %cst_14 {dimension_numbers = #tpu.dot_dimension_numbers<[1], [0], [0], [1], [0, 0, 1, 1], [], []>} : vector<128x128xf32>, vector<128x32xf32>, vector<128x32xf32> -> vector<128x32xf32>
    %21 = vector.broadcast %10 : vector<128x1xf32> to vector<128x32xf32>
    %22 = arith.mulf %20, %21 : vector<128x32xf32>
    %23 = vector.broadcast %12 : vector<1x32xf32> to vector<128x32xf32>
    %24 = arith.addf %22, %23 : vector<128x32xf32>
    %cst_15 = arith.constant 0.000000e+00 : f32
    %25 = vector.broadcast %cst_15 : f32 to vector<128x32xf32>
    %26 = arith.maximumf %24, %25 : vector<128x32xf32>
    %cst_16 = arith.constant dense<0.000000e+00> : vector<128x32xf32>
    %27 = tpu.matmul %26, %13, %cst_16 {dimension_numbers = #tpu.dot_dimension_numbers<[1], [0], [0], [1], [0, 0, 1, 1], [], []>} : vector<128x32xf32>, vector<32x32xf32>, vector<128x32xf32> -> vector<128x32xf32>
    %28 = vector.broadcast %10 : vector<128x1xf32> to vector<128x32xf32>
    %29 = arith.mulf %27, %28 : vector<128x32xf32>
    %cst_17 = arith.constant dense<0.000000e+00> : vector<128x32xf32>
    %30 = tpu.matmul %3, %29, %cst_17 {dimension_numbers = #tpu.dot_dimension_numbers<[1], [0], [0], [1], [0, 0, 1, 1], [], []>} : vector<128x128xf32>, vector<128x32xf32>, vector<128x32xf32> -> vector<128x32xf32>
    %31 = vector.broadcast %10 : vector<128x1xf32> to vector<128x32xf32>
    %32 = arith.mulf %30, %31 : vector<128x32xf32>
    %33 = vector.broadcast %14 : vector<1x32xf32> to vector<128x32xf32>
    %34 = arith.addf %32, %33 : vector<128x32xf32>
    %cst_18 = arith.constant 0.000000e+00 : f32
    %35 = vector.broadcast %cst_18 : f32 to vector<128x32xf32>
    %36 = arith.maximumf %34, %35 : vector<128x32xf32>
    "tpu.trace_start"() <{level = 10 : i32, message = "ok,rk->or"}> : () -> ()
    %cst_19 = arith.constant dense<0.000000e+00> : vector<8x128xf32>
    %37 = tpu.matmul %15, %36, %cst_19 {dimension_numbers = #tpu.dot_dimension_numbers<[1], [1], [0], [0], [0, 0, 1, 0], [], []>} : vector<8x32xf32>, vector<128x32xf32>, vector<8x128xf32> -> vector<8x128xf32>
    "tpu.trace_stop"() : () -> ()
    %c0_20 = arith.constant 0 : index
    %c0_21 = arith.constant 0 : index
    %38 = vector.load %arg4[%c0_20, %c0_21] : memref<8x1xf32, #tpu.memory_space<vmem>>, vector<8x1xf32>
    %39 = vector.broadcast %38 : vector<8x1xf32> to vector<8x128xf32>
    %40 = arith.addf %37, %39 : vector<8x128xf32>
    %41 = vector.broadcast %0 : vector<1x128xf32> to vector<8x128xf32>
    %42 = arith.mulf %40, %41 : vector<8x128xf32>
    %c0_22 = arith.constant 0 : index
    %c0_23 = arith.constant 0 : index
    %43 = vector.load %arg5[%c0_22, %c0_23] : memref<8x128xf32, #tpu.memory_space<vmem>>, vector<8x128xf32>
    tpu.vector_store %arg5[%c0_22, %c0_23], %42 {strides = array<i32>} : memref<8x128xf32, #tpu.memory_space<vmem>>, vector<8x128xf32>,
    return
  }
}

</mosaic_0001>

<bundles_post_ra>
// kernel: gcn_only_forward.1
= control target key start
LH: loop header
LB: loop body
LE: loop exit
PB: predicated region body
PF: predicated region fallthrough
CT: control target
= control target key end

     0   :  { %vm212_vm0 = vcmask 1043456   ;;  %vm163_vm1 = vcmask 31744   ;;  %s2116_s3 = inlined_call_operand.vmem [shape: f32[64,32], index: 3, kind: input, shape index: {}]   ;;  %s2117_s2 = inlined_call_operand.vmem [shape: f32[128,4], index: 2, kind: input, shape index: {}]   ;;  %s2118_s0 = inlined_call_operand.vmem [shape: f32[1,128], index: 0, kind: input, shape index: {}]   ;;  %s2119_s1 = inlined_call_operand.vmem [shape: f32[128,128], index: 1, kind: input, shape index: {}]   ;;  %s2120_s4 = inlined_call_operand.vmem [shape: f32[8,1], index: 4, kind: input, shape index: {}]   ;;  %s2121_s5 = inlined_call_operand.vmem [shape: f32[8,128], index: 5, kind: output, shape index: {}]  }
   0x1   :  { %v139_v0 = vld [vmem:[%s2116_s3] sm:$0xf]  ;;  %v148_v2 = vld [vmem:[%s2117_s2 + $0x8] sm:$0xff]  ;;  %v149_v3 = vld [vmem:[%s2117_s2 + $0x10] sm:$0xff] }
   0x2   :  { %1285 = vmatprep.subr.msk.mxu1 %vm212_vm0, %v139_v0  ;;  %v147_v1 = vld [vmem:[%s2117_s2] sm:$0xff]  ;;  %v150_v4 = vld [vmem:[%s2117_s2 + $0x18] sm:$0xff]  ;;  %v23_v9 = vld [vmem:[%s2119_s1 + $0x10] sm:$0xff] }
   0x3   :  { %1286 = vmatpush3.msk.msra.mxu1 %vm212_vm0, %v139_v0  ;;  %1287 = vmatprep.mubr.msk.f32.mxu1 %vm163_vm1, %v147_v1  ;;  %v151_v5 = vld [vmem:[%s2117_s2 + $0x20] sm:$0xff]  ;;  %v22_v10 = vld [vmem:[%s2119_s1 + $0x8] sm:$0xff]  ;;  %v24_v11 = vld [vmem:[%s2119_s1 + $0x18] sm:$0xff] }
   0x4   :  { %1288 = vmatmul.mubr.msk.f32.vlgmr.msra.gmra.mrb[0].mxu1 %vm163_vm1, %v148_v2  ;;  %v1689_v6 = vld [vmem:[%s2118_s0] ss:$0 sm:$0xff]  ;;  %v152_v12 = vld [vmem:[%s2117_s2 + $0x28] sm:$0xff]  ;;  %v153_v14 = vld [vmem:[%s2117_s2 + $0x30] sm:$0xff] }
   0x5   :  { %1290 = vmatprep.mubr.msk.f32.mxu1 %vm163_vm1, %v149_v3  ;;  %v21_v7 = vld [vmem:[%s2119_s1] sm:$0xff]  ;;  %v1712_v13 = vmul.f32 %v1689_v6, %v23_v9  ;;  %v1719_v15 = vmul.f32 %v1689_v6, %v22_v10  ;;  %v1723_v16 = vmul.f32 %v1689_v6, %v24_v11  ;;  %v26_v18 = vld [vmem:[%s2119_s1 + $0x28] sm:$0xff]  ;;  %v154_v19 = vld [vmem:[%s2117_s2 + $0x38] sm:$0xff] }
   0x6   :  { %v1696_v8 = vmul.f32 %v1689_v6, %v21_v7  ;;  %v25_v17 = vld [vmem:[%s2119_s1 + $0x20] sm:$0xff]  ;;  %v1745_v22 = vmul.f32 %v1689_v6, %v26_v18  ;;  %v27_v23 = vld [vmem:[%s2119_s1 + $0x30] sm:$0xff]  ;;  %v28_v24 = vld [vmem:[%s2119_s1 + $0x38] sm:$0xff] }
   0x7   :  { %63 = vadd.xlane.f32.xlu1 %v1712_v13  ;;  %v155_v20 = vld [vmem:[%s2117_s2 + $0x40] sm:$0xff]  ;;  %v1741_v21 = vmul.f32 %v1689_v6, %v25_v17  ;;  %v156_v25 = vld [vmem:[%s2117_s2 + $0x48] sm:$0xff]  ;;  %v157_v26 = vld [vmem:[%s2117_s2 + $0x50] sm:$0xff]  ;;  %v1763_v27 = vmul.f32 %v1689_v6, %v27_v23  ;;  %v1767_v28 = vmul.f32 %v1689_v6, %v28_v24 }
   0x8   :  { %1291 = vmatmul.mubr.msk.f32.gmra.mrb[2].mxu1 %vm163_vm1, %v150_v4  ;;  %59 = vadd.xlane.f32.xlu0 %v1696_v8  ;;  %v29_v29 = vld [vmem:[%s2119_s1 + $0x40] sm:$0xff]  ;;  %v30_v30 = vld [vmem:[%s2119_s1 + $0x48] sm:$0xff]  ;;  %v158_v31 = vld [vmem:[%s2117_s2 + $0x58] sm:$0xff] }
   0x9   :  { %1293 = vmatprep.mubr.msk.f32.mxu1 %vm163_vm1, %v151_v5  ;;  %v159_v32 = vld [vmem:[%s2117_s2 + $0x60] sm:$0xff]  ;;  %v1785_v33 = vmul.f32 %v1689_v6, %v29_v29  ;;  %v1789_v34 = vmul.f32 %v1689_v6, %v30_v30  ;;  %v31_v35 = vld [vmem:[%s2119_s1 + $0x50] sm:$0xff]  ;;  %v32_v36 = vld [vmem:[%s2119_s1 + $0x58] sm:$0xff] }
   0xa   :  { %v160_v37 = vld [vmem:[%s2117_s2 + $0x68] sm:$0xff]  ;;  %v161_v38 = vld [vmem:[%s2117_s2 + $0x70] sm:$0xff]  ;;  %v1807_v39 = vmul.f32 %v1689_v6, %v31_v35  ;;  %v1811_v40 = vmul.f32 %v1689_v6, %v32_v36  ;;  %v33_v41 = vld [vmem:[%s2119_s1 + $0x60] sm:$0xff] }
   0xb   :  { %65 = vadd.xlane.f32.xlu1 %v1723_v16  ;;  %v34_v42 = vld [vmem:[%s2119_s1 + $0x68] sm:$0xff]  ;;  %v162_v43 = vld [vmem:[%s2117_s2 + $0x78] sm:$0xff]  ;;  %v1826_v44 = vmul.f32 %v1689_v6, %v33_v41  ;;  %v35_v46 = vld [vmem:[%s2119_s1 + $0x70] sm:$0xff] }
   0xc   :  { %1294 = vmatmul.mubr.msk.f32.gmra.mrb[4].mxu1 %vm163_vm1, %v152_v12  ;;  %61 = vadd.xlane.f32.xlu0 %v1719_v15  ;;  %v1830_v45 = vmul.f32 %v1689_v6, %v34_v42  ;;  %v36_v47 = vld [vmem:[%s2119_s1 + $0x78] sm:$0xff]  ;;  %v1842_v48 = vmul.f32 %v1689_v6, %v35_v46 }
   0xd   :  { %1296 = vmatprep.mubr.msk.f32.mxu1 %vm163_vm1, %v153_v14  ;;  %v1846_v49 = vmul.f32 %v1689_v6, %v36_v47 }
   0xf   :  { %69 = vadd.xlane.f32.xlu1 %v1745_v22 }
  0x10   :  { %1297 = vmatmul.mubr.msk.f32.gmra.mrb[6].mxu1 %vm163_vm1, %v154_v19  ;;  %67 = vadd.xlane.f32.xlu0 %v1741_v21 }
  0x11   :  { %1299 = vmatprep.mubr.msk.f32.mxu1 %vm163_vm1, %v155_v20 }
  0x13   :  { %73 = vadd.xlane.f32.xlu1 %v1767_v28 }
  0x14   :  { %1300 = vmatmul.mubr.msk.f32.gmra.mrb[8].mxu1 %vm163_vm1, %v156_v25  ;;  %71 = vadd.xlane.f32.xlu0 %v1763_v27 }
  0x15   :  { %1302 = vmatprep.mubr.msk.f32.mxu1 %vm163_vm1, %v157_v26 }
  0x17   :  { %77 = vadd.xlane.f32.xlu1 %v1789_v34 }
  0x18   :  { %1303 = vmatmul.mubr.msk.f32.gmra.mrb[10].mxu1 %vm163_vm1, %v158_v31  ;;  %75 = vadd.xlane.f32.xlu0 %v1785_v33 }
  0x19   :  { %1305 = vmatprep.mubr.msk.f32.mxu1 %vm163_vm1, %v159_v32 }
  0x1b   :  { %81 = vadd.xlane.f32.xlu1 %v1811_v40 }
  0x1c   :  { %1306 = vmatmul.mubr.msk.f32.gmra.mrb[12].mxu1 %vm163_vm1, %v160_v37  ;;  %79 = vadd.xlane.f32.xlu0 %v1807_v39 }
  0x1d   :  { %1308 = vmatprep.mubr.msk.f32.mxu1 %vm163_vm1, %v161_v38 }
  0x1f   :  { %85 = vadd.xlane.f32.xlu1 %v1830_v45 }
  0x20   :  { %1309 = vmatmul.mubr.msk.f32.gmra.mrb[14].mxu1 %vm163_vm1, %v162_v43  ;;  %83 = vadd.xlane.f32.xlu0 %v1826_v44 }
  0x21   :  { %1343 = vmatprep.mubr.f32.mxu1 %v1696_v8 }
  0x23   :  { %89 = vadd.xlane.f32.xlu1 %v1846_v49 }
  0x24   :  { %87 = vadd.xlane.f32.xlu0 %v1842_v48 }
  0x94   :  { %v64_v50 = vpop.xlane.xlu1 %63 }
  0x95   :  { %v60_v51 = vpop.xlane.xlu0 %59  ;;  %vm93_vm5 = vcmp.gt.f32.partialorder %v64_v50, 0.0 }
  0x96   :  { %vm91_vm3 = vcmp.gt.f32.partialorder %v60_v51, 0.0 }
  0x98   :  { %v66_v52 = vpop.xlane.xlu1 %65 }
  0x99   :  { %v62_v53 = vpop.xlane.xlu0 %61  ;;  %vm94_vm4 = vcmp.gt.f32.partialorder %v66_v52, 0.0 }
  0x9a   :  { %1599 = vrsqrt.f32 %v62_v53  ;;  %vm92_vm2 = vcmp.gt.f32.partialorder %v62_v53, 0.0 }
  0x9b   :  { %1601 = vrsqrt.f32 %v60_v51 }
  0x9c   :  { %v70_v54 = vpop.xlane.xlu1 %69  ;;  %1603 = vrsqrt.f32 %v66_v52 }
  0x9d   :  { %v68_v55 = vpop.xlane.xlu0 %67  ;;  %1605 = vrsqrt.f32 %v64_v50  ;;  %vm96_vm6 = vcmp.gt.f32.partialorder %v70_v54, 0.0 }
  0x9e   :  { %1607 = vrsqrt.f32 %v70_v54  ;;  %vm95_vm7 = vcmp.gt.f32.partialorder %v68_v55, 0.0 }
  0x9f   :  { %1609 = vrsqrt.f32 %v68_v55 }
  0xa0   :  { %v74_v56 = vpop.xlane.xlu1 %73 }
  0xa1   :  { %v1850_v57 = vpop.xlane.xlu0 %71  ;;  %1611 = vrsqrt.f32 %v74_v56  ;;  %vm98_vm8 = vcmp.gt.f32.partialorder %v74_v56, 0.0 }
  0xa2   :  { %1613 = vrsqrt.f32 %v1850_v57  ;;  %vm97_vm9 = vcmp.gt.f32.partialorder %v1850_v57, 0.0 }
  0xa4   :  { %v1852_v58 = vpop.xlane.xlu1 %77  ;;  %v1600_v60 = vpop.eup %1599 }
  0xa5   :  { %v1854_v59 = vpop.xlane.xlu0 %75  ;;  %v1602_v61 = vpop.eup %1601  ;;  %v1856_v62 = vsel %vm92_vm2, %v1600_v60, 0.0  ;;  %1615 = vrsqrt.f32 %v1852_v58  ;;  %vm100_vm10 = vcmp.gt.f32.partialorder %v1852_v58, 0.0  ;;  %vm574_vm2 = vcmask 261120  }
  0xa6   :  { %v1604_v1 = vpop.eup %1603  ;;  %v1861_v2 = vsel %vm91_vm3, %v1602_v61, 0.0  ;;  %1617 = vrsqrt.f32 %v1854_v59  ;;  %vm99_vm11 = vcmp.gt.f32.partialorder %v1854_v59, 0.0  ;;  %vm1632_vm3 = vmmov 0  }
  0xa7   :  { %v1606_v7 = vpop.eup %1605  ;;  %v1868_v10 = vsel %vm94_vm4, %v1604_v1, 0.0  ;;  %vm2056_vm4 = vmpackc.low %vm574_vm2, %vm574_vm2 }
  0xa8   :  { %v1859_v63 = vpop.xlane.xlu1 %81  ;;  %v1608_v14 = vpop.eup %1607  ;;  %v1871_v17 = vsel %vm93_vm5, %v1606_v7, 0.0 }
  0xa9   :  { %v1863_v3 = vpop.xlane.xlu0 %79  ;;  %v1610_v20 = vpop.eup %1609  ;;  %1619 = vrsqrt.f32 %v1859_v63  ;;  %v1880_v26 = vsel %vm96_vm6, %v1608_v14, 0.0  ;;  %vm102_vm12 = vcmp.gt.f32.partialorder %v1859_v63, 0.0 }
  0xaa   :  { %1621 = vrsqrt.f32 %v1863_v3  ;;  %v1883_v32 = vsel %vm95_vm7, %v1610_v20, 0.0  ;;  %vm101_vm13 = vcmp.gt.f32.partialorder %v1863_v3, 0.0 }
  0xab   :  { %v1612_v31 = vpop.eup %1611 }
  0xac   :  { %v1874_v23 = vpop.xlane.xlu1 %85  ;;  %v1614_v37 = vpop.eup %1613  ;;  %v1889_v41 = vsel %vm98_vm8, %v1612_v31, 0.0 }
  0xad   :  { %v1878_v25 = vpop.xlane.xlu0 %83  ;;  %1623 = vrsqrt.f32 %v1874_v23  ;;  %v1892_v50 = vsel %vm97_vm9, %v1614_v37, 0.0  ;;  %vm104_vm14 = vcmp.gt.f32.partialorder %v1874_v23, 0.0 }
  0xae   :  { %1625 = vrsqrt.f32 %v1878_v25  ;;  %vm103_vm15 = vcmp.gt.f32.partialorder %v1878_v25, 0.0 }
  0xaf   :  { %v1616_v47 = vpop.eup %1615 }
  0xb0   :  { %v90_v42 = vpop.xlane.xlu1 %89  ;;  %v1618_v54 = vpop.eup %1617  ;;  %v1898_v56 = vsel %vm100_vm10, %v1616_v47, 0.0 }
  0xb1   :  { %v88_v51 = vpop.xlane.xlu0 %87  ;;  %1627 = vrsqrt.f32 %v90_v42  ;;  %vm106_vm0 = vcmp.gt.f32.partialorder %v90_v42, 0.0 }
  0xb2   :  { %1629 = vrsqrt.f32 %v88_v51  ;;  %vm105_vm1 = vcmp.gt.f32.partialorder %v88_v51, 0.0  ;;  %v141_v51 = vld [vmem:[%s2116_s3 + $0x10] sm:$0xff] }
  0xb3   :  { %v1620_v61 = vpop.eup %1619 }
  0xd7   :  { %v1289_v0 = vpop.f32.mrb[0].mxu1 }
  0xd8   :  { %v362_v4 = vmul.f32 %v1289_v0, %v1856_v62  ;;  %v282_v5 = vpop.f32.mrb[1].mxu1  ;;  %v1900_v0 = vsel %vm99_vm11, %v1618_v54, 0.0 }
  0xd9   :  { %v361_v9 = vmul.f32 %v282_v5, %v1861_v2  ;;  %v1906_v5 = vsel %vm102_vm12, %v1620_v61, 0.0 }
  0xdb   :  { %v1490_v11 = vpack.c.bf16 %v362_v4, %v361_v9  ;;  %v1292_v12 = vpop.f32.mrb[2].mxu1  ;;  %v1622_v4 = vpop.eup %1621 }
  0xdc   :  { %v364_v18 = vmul.f32 %v1292_v12, %v1868_v10  ;;  %v292_v19 = vpop.f32.mrb[3].mxu1  ;;  %v1908_v12 = vsel %vm101_vm13, %v1622_v4, 0.0 }
  0xdd   :  { %v363_v24 = vmul.f32 %v292_v19, %v1871_v17  ;;  %1491 = vmatprep.subr.bf16.mxu1 %v1490_v11 }
  0xde   :  { %1493 = vmatpush3.bf16.msra.mxu1 %v1490_v11  ;;  %v1624_v11 = vpop.eup %1623 }
  0xdf   :  { %v1494_v29 = vpack.c.bf16 %v364_v18, %v363_v24  ;;  %v1295_v30 = vpop.f32.mrb[4].mxu1  ;;  %v1626_v18 = vpop.eup %1625  ;;  %v1914_v19 = vsel %vm104_vm14, %v1624_v11, 0.0 }
  0xe0   :  { %v366_v35 = vmul.f32 %v1295_v30, %v1880_v26  ;;  %v302_v36 = vpop.f32.mrb[5].mxu1  ;;  %v1916_v30 = vsel %vm103_vm15, %v1626_v18, 0.0 }
  0xe1   :  { %v365_v38 = vmul.f32 %v302_v36, %v1883_v32  ;;  %1495 = vmatprep.subr.bf16.mxu1 %v1494_v29 }
  0xe2   :  { %1497 = vmatpush3.bf16.msra.mxu1 %v1494_v29  ;;  %v1628_v29 = vpop.eup %1627 }
  0xe3   :  { %v1498_v43 = vpack.c.bf16 %v366_v35, %v365_v38  ;;  %v1298_v46 = vpop.f32.mrb[6].mxu1  ;;  %v1630_v35 = vpop.eup %1629  ;;  %v1920_v25 = vsel %vm106_vm0, %v1628_v29, 0.0 }
  0xe4   :  { %v368_v52 = vmul.f32 %v1298_v46, %v1889_v41  ;;  %v312_v53 = vpop.f32.mrb[7].mxu1 }
  0xe5   :  { %v367_v55 = vmul.f32 %v312_v53, %v1892_v50  ;;  %1499 = vmatprep.subr.bf16.mxu1 %v1498_v43  ;;  %v142_v53 = vld [vmem:[%s2116_s3 + $0x18] sm:$0xff] }
  0xe6   :  { %1501 = vmatpush3.bf16.msra.mxu1 %v1498_v43  ;;  %v1922_v43 = vsel %vm105_vm1, %v1630_v35, 0.0  ;;  %v1522_v54 = vpack.c.bf16 %v142_v53, %v141_v51 }
  0xe7   :  { %v1502_v57 = vpack.c.bf16 %v368_v52, %v367_v55  ;;  %v1301_v60 = vpop.f32.mrb[8].mxu1  ;;  %v143_v55 = vld [vmem:[%s2116_s3 + $0x20] sm:$0xff] }
  0xe8   :  { %v370_v58 = vmul.f32 %v1301_v60, %v1898_v56  ;;  %v322_v1 = vpop.f32.mrb[9].mxu1  ;;  %1523 = vmatprep.subr.bf16.mxu0 %v1522_v54  ;;  %v1957_v60 = vld [vmem:[%s2116_s3 + $0x8] ss:$0 sm:$0xff] }
  0xe9   :  { %v369_v59 = vmul.f32 %v322_v1, %v1900_v0  ;;  %1503 = vmatprep.subr.bf16.mxu1 %v1502_v57  ;;  %1525 = vmatpush3.bf16.msra.mxu0 %v1522_v54 }
  0xea   :  { %1505 = vmatpush3.bf16.msra.mxu1 %v1502_v57  ;;  %v144_v57 = vld [vmem:[%s2116_s3 + $0x28] sm:$0xff] }
  0xeb   :  { %v1506_v7 = vpack.c.bf16 %v370_v58, %v369_v59  ;;  %v1304_v9 = vpop.f32.mrb[10].mxu1 }
  0xec   :  { %v372_v63 = vmul.f32 %v1304_v9, %v1906_v5  ;;  %v332_v14 = vpop.f32.mrb[11].mxu1 }
  0xed   :  { %v371_v3 = vmul.f32 %v332_v14, %v1908_v12  ;;  %1507 = vmatprep.subr.bf16.mxu1 %v1506_v7 }
  0xee   :  { %1509 = vmatpush3.bf16.msra.mxu1 %v1506_v7 }
  0xef   :  { %v1510_v20 = vpack.c.bf16 %v372_v63, %v371_v3  ;;  %v1307_v24 = vpop.f32.mrb[12].mxu1 }
  0xf0   :  { %v374_v23 = vmul.f32 %v1307_v24, %v1914_v19  ;;  %v342_v31 = vpop.f32.mrb[13].mxu1 }
  0xf1   :  { %v373_v36 = vmul.f32 %v342_v31, %v1916_v30  ;;  %1511 = vmatprep.subr.bf16.mxu1 %v1510_v20 }
  0xf2   :  { %1513 = vmatpush3.bf16.msra.mxu1 %v1510_v20 }
  0xf3   :  { %v1514_v37 = vpack.c.bf16 %v374_v23, %v373_v36  ;;  %v1310_v38 = vpop.f32.mrb[14].mxu1 }
  0xf4   :  { %v376_v46 = vmul.f32 %v1310_v38, %v1920_v25  ;;  %v352_v47 = vpop.f32.mrb[15].mxu1 }
  0xf5   :  { %v375_v42 = vmul.f32 %v352_v47, %v1922_v43  ;;  %1515 = vmatprep.subr.bf16.mxu1 %v1514_v37 }
  0xf6   :  { %1517 = vmatpush3.bf16.msra.mxu1 %v1514_v37 }
  0xf7   :  { %v1518_v52 = vpack.c.bf16 %v376_v46, %v375_v42 }
  0xf9   :  { %1519 = vmatprep.subr.bf16.mxu1 %v1518_v52 }
  0xfa   :  { %1521 = vmatpush3.bf16.msra.mxu1 %v1518_v52 }
  0xfd   :  { %1344 = vmatmul.mubr.f32.vlgmr.msra.gmra.mrb[16].mxu1 %v1719_v15 }
  0xfe   :  { %1346 = vmatprep.mubr.f32.mxu1 %v1712_v13 }
 0x101   :  { %1347 = vmatmul.mubr.f32.gmra.mrb[18].mxu1 %v1723_v16 }
 0x102   :  { %1349 = vmatprep.mubr.f32.mxu1 %v1741_v21 }
 0x105   :  { %1350 = vmatmul.mubr.f32.gmra.mrb[20].mxu1 %v1745_v22 }
 0x106   :  { %1352 = vmatprep.mubr.f32.mxu1 %v1763_v27 }
 0x109   :  { %1353 = vmatmul.mubr.f32.gmra.mrb[22].mxu1 %v1767_v28 }
 0x10a   :  { %1355 = vmatprep.mubr.f32.mxu1 %v1785_v33 }
 0x10d   :  { %1356 = vmatmul.mubr.f32.gmra.mrb[24].mxu1 %v1789_v34 }
 0x10e   :  { %1358 = vmatprep.mubr.f32.mxu1 %v1807_v39 }
 0x111   :  { %1359 = vmatmul.mubr.f32.gmra.mrb[26].mxu1 %v1811_v40 }
 0x112   :  { %1361 = vmatprep.mubr.f32.mxu1 %v1826_v44 }
 0x115   :  { %1362 = vmatmul.mubr.f32.gmra.mrb[28].mxu1 %v1830_v45 }
 0x116   :  { %1364 = vmatprep.mubr.f32.mxu1 %v1842_v48 }
 0x119   :  { %1365 = vmatmul.mubr.f32.gmra.mrb[30].mxu1 %v1846_v49 }
 0x11a   :  { %1431 = vmatprep.mubr.f32.mxu1 %v1696_v8  ;;  %v1526_v8 = vpack.c.bf16 %v144_v57, %v143_v55 }
 0x11c   :  { %1527 = vmatprep.subr.bf16.mxu0 %v1526_v8 }
 0x11d   :  { %1529 = vmatpush3.bf16.msra.mxu0 %v1526_v8 }
 0x1d0   :  { %v1345_v61 = vpop.f32.mrb[16].mxu1 }
 0x1d1   :  { %v523_v58 = vmul.f32 %v1345_v61, %v1856_v62  ;;  %v443_v1 = vpop.f32.mrb[17].mxu1 }
 0x1d2   :  { %v522_v4 = vmul.f32 %v443_v1, %v1861_v2 }
 0x1d3   :  { %v543_v59 = vadd.f32 %v1957_v60, %v523_v58 }
 0x1d4   :  { %v1348_v7 = vpop.f32.mrb[18].mxu1  ;;  %v542_v9 = vadd.f32 %v1957_v60, %v522_v4 }
 0x1d5   :  { %v525_v11 = vmul.f32 %v1348_v7, %v1868_v10  ;;  %v453_v63 = vpop.f32.mrb[19].mxu1  ;;  %v559_v3 = vmax.f32 %v543_v59, 0.0 }
 0x1d6   :  { %v524_v14 = vmul.f32 %v453_v63, %v1871_v17  ;;  %v558_v18 = vmax.f32 %v542_v9, 0.0 }
 0x1d7   :  { %v545_v20 = vadd.f32 %v1957_v60, %v525_v11 }
 0x1d8   :  { %v544_v24 = vadd.f32 %v1957_v60, %v524_v14  ;;  %v1351_v29 = vpop.f32.mrb[20].mxu1  ;;  %1375 = vmatprep.mubr.msk.f32.mxu0 %vm574_vm2, %v558_v18 }
 0x1d9   :  { %v527_v23 = vmul.f32 %v1351_v29, %v1880_v26  ;;  %v463_v31 = vpop.f32.mrb[21].mxu1  ;;  %1376 = vmatmul.mubr.msk.f32.vlgmr.msra.gmra.mrb[0].mxu0 %vm574_vm2, %v559_v3  ;;  %v561_v37 = vmax.f32 %v545_v20, 0.0 }
 0x1da   :  { %v560_v35 = vmax.f32 %v544_v24, 0.0  ;;  %v526_v36 = vmul.f32 %v463_v31, %v1883_v32 }
 0x1db   :  { %v547_v38 = vadd.f32 %v1957_v60, %v527_v23 }
 0x1dc   :  { %v546_v46 = vadd.f32 %v1957_v60, %v526_v36  ;;  %v1354_v47 = vpop.f32.mrb[22].mxu1  ;;  %1378 = vmatprep.mubr.msk.f32.mxu0 %vm574_vm2, %v560_v35 }
 0x1dd   :  { %v529_v42 = vmul.f32 %v1354_v47, %v1889_v41  ;;  %v473_v52 = vpop.f32.mrb[23].mxu1  ;;  %1379 = vmatmul.mubr.msk.f32.gmra.mrb[2].mxu0 %vm574_vm2, %v561_v37  ;;  %v563_v54 = vmax.f32 %v547_v38, 0.0 }
 0x1de   :  { %v562_v51 = vmax.f32 %v546_v46, 0.0  ;;  %v528_v53 = vmul.f32 %v473_v52, %v1892_v50 }
 0x1df   :  { %v549_v55 = vadd.f32 %v1957_v60, %v529_v42 }
 0x1e0   :  { %v548_v57 = vadd.f32 %v1957_v60, %v528_v53  ;;  %v1357_v8 = vpop.f32.mrb[24].mxu1  ;;  %1381 = vmatprep.mubr.msk.f32.mxu0 %vm574_vm2, %v562_v51 }
 0x1e1   :  { %v531_v61 = vmul.f32 %v1357_v8, %v1898_v56  ;;  %v483_v58 = vpop.f32.mrb[25].mxu1  ;;  %1382 = vmatmul.mubr.msk.f32.gmra.mrb[4].mxu0 %vm574_vm2, %v563_v54  ;;  %v565_v59 = vmax.f32 %v549_v55, 0.0 }
 0x1e2   :  { %v564_v1 = vmax.f32 %v548_v57, 0.0  ;;  %v530_v4 = vmul.f32 %v483_v58, %v1900_v0 }
 0x1e3   :  { %v551_v7 = vadd.f32 %v1957_v60, %v531_v61 }
 0x1e4   :  { %v550_v9 = vadd.f32 %v1957_v60, %v530_v4  ;;  %v1360_v11 = vpop.f32.mrb[26].mxu1  ;;  %1384 = vmatprep.mubr.msk.f32.mxu0 %vm574_vm2, %v564_v1 }
 0x1e5   :  { %v533_v63 = vmul.f32 %v1360_v11, %v1906_v5  ;;  %v493_v14 = vpop.f32.mrb[27].mxu1  ;;  %1385 = vmatmul.mubr.msk.f32.gmra.mrb[6].mxu0 %vm574_vm2, %v565_v59  ;;  %v567_v20 = vmax.f32 %v551_v7, 0.0 }
 0x1e6   :  { %v566_v18 = vmax.f32 %v550_v9, 0.0  ;;  %v532_v3 = vmul.f32 %v493_v14, %v1908_v12 }
 0x1e7   :  { %v553_v24 = vadd.f32 %v1957_v60, %v533_v63 }
 0x1e8   :  { %v552_v29 = vadd.f32 %v1957_v60, %v532_v3  ;;  %v1363_v23 = vpop.f32.mrb[28].mxu1  ;;  %1387 = vmatprep.mubr.msk.f32.mxu0 %vm574_vm2, %v566_v18 }
 0x1e9   :  { %v535_v31 = vmul.f32 %v1363_v23, %v1914_v19  ;;  %v503_v35 = vpop.f32.mrb[29].mxu1  ;;  %1388 = vmatmul.mubr.msk.f32.gmra.mrb[8].mxu0 %vm574_vm2, %v567_v20  ;;  %v569_v38 = vmax.f32 %v553_v24, 0.0 }
 0x1ea   :  { %v568_v36 = vmax.f32 %v552_v29, 0.0  ;;  %v534_v37 = vmul.f32 %v503_v35, %v1916_v30 }
 0x1eb   :  { %v555_v46 = vadd.f32 %v1957_v60, %v535_v31 }
 0x1ec   :  { %v554_v47 = vadd.f32 %v1957_v60, %v534_v37  ;;  %v1366_v42 = vpop.f32.mrb[30].mxu1  ;;  %1390 = vmatprep.mubr.msk.f32.mxu0 %vm574_vm2, %v568_v36 }
 0x1ed   :  { %v537_v52 = vmul.f32 %v1366_v42, %v1920_v25  ;;  %v513_v51 = vpop.f32.mrb[31].mxu1  ;;  %1391 = vmatmul.mubr.msk.f32.gmra.mrb[10].mxu0 %vm574_vm2, %v569_v38  ;;  %v571_v55 = vmax.f32 %v555_v46, 0.0 }
 0x1ee   :  { %v570_v53 = vmax.f32 %v554_v47, 0.0  ;;  %v536_v54 = vmul.f32 %v513_v51, %v1922_v43 }
 0x1ef   :  { %v557_v57 = vadd.f32 %v1957_v60, %v537_v52 }
 0x1f0   :  { %v556_v8 = vadd.f32 %v1957_v60, %v536_v54  ;;  %1393 = vmatprep.mubr.msk.f32.mxu0 %vm574_vm2, %v570_v53 }
 0x1f1   :  { %1394 = vmatmul.mubr.msk.f32.gmra.mrb[12].mxu0 %vm574_vm2, %v571_v55  ;;  %v573_v58 = vmax.f32 %v557_v57, 0.0 }
 0x1f2   :  { %v572_v61 = vmax.f32 %v556_v8, 0.0 }
 0x1f4   :  { %1396 = vmatprep.mubr.msk.f32.mxu0 %vm574_vm2, %v572_v61 }
 0x1f5   :  { %1397 = vmatmul.mubr.msk.f32.gmra.mrb[14].mxu0 %vm574_vm2, %v573_v58 }
 0x2ac   :  { %v1377_v1 = vpop.f32.mrb[0].mxu0 }
 0x2ad   :  { %v769_v4 = vmul.f32 %v1377_v1, %v1856_v62  ;;  %v689_v59 = vpop.f32.mrb[1].mxu0 }
 0x2ae   :  { %v768_v7 = vmul.f32 %v689_v59, %v1861_v2 }
 0x2b0   :  { %v1530_v9 = vpack.c.bf16 %v769_v4, %v768_v7  ;;  %v1380_v11 = vpop.f32.mrb[2].mxu0 }
 0x2b1   :  { %v771_v60 = vmul.f32 %v1380_v11, %v1868_v10  ;;  %v699_v63 = vpop.f32.mrb[3].mxu0 }
 0x2b2   :  { %v770_v14 = vmul.f32 %v699_v63, %v1871_v17  ;;  %1531 = vmatprep.subr.bf16.mxu1 %v1530_v9 }
 0x2b3   :  { %1533 = vmatpush3.bf16.msra.mxu1 %v1530_v9 }
 0x2b4   :  { %v1534_v18 = vpack.c.bf16 %v771_v60, %v770_v14  ;;  %v1383_v3 = vpop.f32.mrb[4].mxu0 }
 0x2b5   :  { %v773_v20 = vmul.f32 %v1383_v3, %v1880_v26  ;;  %v709_v24 = vpop.f32.mrb[5].mxu0 }
 0x2b6   :  { %v772_v29 = vmul.f32 %v709_v24, %v1883_v32  ;;  %1535 = vmatprep.subr.bf16.mxu1 %v1534_v18 }
 0x2b7   :  { %1537 = vmatpush3.bf16.msra.mxu1 %v1534_v18 }
 0x2b8   :  { %v1538_v23 = vpack.c.bf16 %v773_v20, %v772_v29  ;;  %v1386_v31 = vpop.f32.mrb[6].mxu0 }
 0x2b9   :  { %v775_v35 = vmul.f32 %v1386_v31, %v1889_v41  ;;  %v719_v36 = vpop.f32.mrb[7].mxu0 }
 0x2ba   :  { %v774_v37 = vmul.f32 %v719_v36, %v1892_v50  ;;  %1539 = vmatprep.subr.bf16.mxu1 %v1538_v23 }
 0x2bb   :  { %1541 = vmatpush3.bf16.msra.mxu1 %v1538_v23 }
 0x2bc   :  { %v1542_v38 = vpack.c.bf16 %v775_v35, %v774_v37  ;;  %v1389_v46 = vpop.f32.mrb[8].mxu0 }
 0x2bd   :  { %v777_v47 = vmul.f32 %v1389_v46, %v1898_v56  ;;  %v729_v42 = vpop.f32.mrb[9].mxu0 }
 0x2be   :  { %v776_v52 = vmul.f32 %v729_v42, %v1900_v0  ;;  %1543 = vmatprep.subr.bf16.mxu1 %v1542_v38 }
 0x2bf   :  { %1545 = vmatpush3.bf16.msra.mxu1 %v1542_v38 }
 0x2c0   :  { %v1546_v51 = vpack.c.bf16 %v777_v47, %v776_v52  ;;  %v1392_v53 = vpop.f32.mrb[10].mxu0 }
 0x2c1   :  { %v779_v54 = vmul.f32 %v1392_v53, %v1906_v5  ;;  %v739_v55 = vpop.f32.mrb[11].mxu0 }
 0x2c2   :  { %v778_v57 = vmul.f32 %v739_v55, %v1908_v12  ;;  %1547 = vmatprep.subr.bf16.mxu1 %v1546_v51 }
 0x2c3   :  { %1549 = vmatpush3.bf16.msra.mxu1 %v1546_v51 }
 0x2c4   :  { %v1550_v8 = vpack.c.bf16 %v779_v54, %v778_v57  ;;  %v1395_v61 = vpop.f32.mrb[12].mxu0 }
 0x2c5   :  { %v781_v58 = vmul.f32 %v1395_v61, %v1914_v19  ;;  %v749_v1 = vpop.f32.mrb[13].mxu0 }
 0x2c6   :  { %v780_v4 = vmul.f32 %v749_v1, %v1916_v30  ;;  %1551 = vmatprep.subr.bf16.mxu1 %v1550_v8 }
 0x2c7   :  { %1553 = vmatpush3.bf16.msra.mxu1 %v1550_v8 }
 0x2c8   :  { %v1554_v59 = vpack.c.bf16 %v781_v58, %v780_v4  ;;  %v1398_v7 = vpop.f32.mrb[14].mxu0 }
 0x2c9   :  { %v783_v9 = vmul.f32 %v1398_v7, %v1920_v25  ;;  %v759_v11 = vpop.f32.mrb[15].mxu0 }
 0x2ca   :  { %v782_v60 = vmul.f32 %v759_v11, %v1922_v43  ;;  %1555 = vmatprep.subr.bf16.mxu1 %v1554_v59 }
 0x2cb   :  { %1557 = vmatpush3.bf16.msra.mxu1 %v1554_v59 }
 0x2cc   :  { %v1558_v63 = vpack.c.bf16 %v783_v9, %v782_v60 }
 0x2ce   :  { %1559 = vmatprep.subr.bf16.mxu1 %v1558_v63 }
 0x2cf   :  { %1561 = vmatpush3.bf16.msra.mxu1 %v1558_v63 }
 0x2d2   :  { %1432 = vmatmul.mubr.f32.vlgmr.msra.gmra.mrb[32].mxu1 %v1719_v15  ;;  %v1633_v15 = vmov 0.0  }
 0x2d3   :  { %1434 = vmatprep.mubr.f32.mxu1 %v1712_v13  ;;  %v1631_v13 = vmov 0.0|0.0   ;;  %1487 = vmatprep.mubr.msk.f32.mxu0 %vm1632_vm3, %v1633_v15 }
 0x2d4   :  { %1562 = vmatprep.subr.bf16.mxu0 %v1631_v13 }
 0x2d6   :  { %1435 = vmatmul.mubr.f32.gmra.mrb[34].mxu1 %v1723_v16  ;;  %v1634_v16 = vmov 0  }
 0x2d7   :  { %1437 = vmatprep.mubr.f32.mxu1 %v1741_v21  ;;  %1598 = vset.pattern.permute.xlu0 %v1634_v16  ;;  %v981_v21 = vld [vmem:[%s2120_s4] sm:$0xff] }
 0x2d8   :  { %984 = vperm.xlu0 %1598, %v981_v21  }
 0x2da   :  { %1438 = vmatmul.mubr.f32.gmra.mrb[36].mxu1 %v1745_v22  ;;  %v2045_v22 = vld [vmem:[%s2116_s3 + $0x30] ss:$0 sm:$0xff] }
 0x2db   :  { %1440 = vmatprep.mubr.f32.mxu1 %v1763_v27 }
 0x2de   :  { %1441 = vmatmul.mubr.f32.gmra.mrb[38].mxu1 %v1767_v28 }
 0x2df   :  { %1443 = vmatprep.mubr.f32.mxu1 %v1785_v33 }
 0x2e2   :  { %1444 = vmatmul.mubr.f32.gmra.mrb[40].mxu1 %v1789_v34 }
 0x2e3   :  { %1446 = vmatprep.mubr.f32.mxu1 %v1807_v39 }
 0x2e6   :  { %1447 = vmatmul.mubr.f32.gmra.mrb[42].mxu1 %v1811_v40 }
 0x2e7   :  { %1449 = vmatprep.mubr.f32.mxu1 %v1826_v44 }
 0x2ea   :  { %1450 = vmatmul.mubr.f32.gmra.mrb[44].mxu1 %v1830_v45 }
 0x2eb   :  { %1452 = vmatprep.mubr.f32.mxu1 %v1842_v48 }
 0x2ee   :  { %1453 = vmatmul.mubr.f32.gmra.mrb[46].mxu1 %v1846_v49 }
 0x3a5   :  { %v1433_v27 = vpop.f32.mrb[32].mxu1 }
 0x3a6   :  { %v930_v28 = vmul.f32 %v1433_v27, %v1856_v62  ;;  %v850_v33 = vpop.f32.mrb[33].mxu1 }
 0x3a7   :  { %v929_v34 = vmul.f32 %v850_v33, %v1861_v2 }
 0x3a8   :  { %v950_v39 = vadd.f32 %v2045_v22, %v930_v28 }
 0x3a9   :  { %v949_v40 = vadd.f32 %v2045_v22, %v929_v34  ;;  %v1436_v44 = vpop.f32.mrb[34].mxu1 }
 0x3aa   :  { %v966_v45 = vmax.f32 %v950_v39, 0.0  ;;  %v932_v48 = vmul.f32 %v1436_v44, %v1868_v10  ;;  %v860_v49 = vpop.f32.mrb[35].mxu1 }
 0x3ab   :  { %v965_v14 = vmax.f32 %v949_v40, 0.0  ;;  %v931_v18 = vmul.f32 %v860_v49, %v1871_v17 }
 0x3ac   :  { %v952_v3 = vadd.f32 %v2045_v22, %v932_v48 }
 0x3ad   :  { %v1563_v2 = vpack.c.bf16 %v966_v45, %v965_v14  ;;  %v951_v20 = vadd.f32 %v2045_v22, %v931_v18  ;;  %v1439_v24 = vpop.f32.mrb[36].mxu1 }
 0x3ae   :  { %v968_v29 = vmax.f32 %v952_v3, 0.0  ;;  %v934_v23 = vmul.f32 %v1439_v24, %v1880_v26  ;;  %v870_v10 = vpop.f32.mrb[37].mxu1 }
 0x3af   :  { %v967_v31 = vmax.f32 %v951_v20, 0.0  ;;  %v933_v35 = vmul.f32 %v870_v10, %v1883_v32  ;;  %1565 = vmatpush3.bf16.xpose.msk.msra.mxu0 %vm2056_vm4, %v1563_v2 }
 0x3b0   :  { %v954_v17 = vadd.f32 %v2045_v22, %v934_v23  ;;  %1566 = vmatprep.subr.bf16.mxu0 %v1631_v13 }
 0x3b1   :  { %v1567_v36 = vpack.c.bf16 %v968_v29, %v967_v31  ;;  %v953_v37 = vadd.f32 %v2045_v22, %v933_v35  ;;  %v1442_v38 = vpop.f32.mrb[38].mxu1 }
 0x3b2   :  { %v970_v46 = vmax.f32 %v954_v17, 0.0  ;;  %v936_v47 = vmul.f32 %v1442_v38, %v1889_v41  ;;  %v880_v42 = vpop.f32.mrb[39].mxu1 }
 0x3b3   :  { %v969_v26 = vmax.f32 %v953_v37, 0.0  ;;  %v935_v52 = vmul.f32 %v880_v42, %v1892_v50 }
 0x3b4   :  { %v956_v32 = vadd.f32 %v2045_v22, %v936_v47 }
 0x3b5   :  { %v1571_v51 = vpack.c.bf16 %v970_v46, %v969_v26  ;;  %v955_v53 = vadd.f32 %v2045_v22, %v935_v52  ;;  %v1445_v54 = vpop.f32.mrb[40].mxu1 }
 0x3b6   :  { %v972_v55 = vmax.f32 %v956_v32, 0.0  ;;  %v938_v57 = vmul.f32 %v1445_v54, %v1898_v56  ;;  %v890_v8 = vpop.f32.mrb[41].mxu1 }
 0x3b7   :  { %v971_v61 = vmax.f32 %v955_v53, 0.0  ;;  %v937_v58 = vmul.f32 %v890_v8, %v1900_v0  ;;  %1569 = vmatpush3.bf16.xpose.msk.msra.mxu0 %vm2056_vm4, %v1567_v36 }
 0x3b8   :  { %v958_v41 = vadd.f32 %v2045_v22, %v938_v57  ;;  %1570 = vmatprep.subr.bf16.mxu0 %v1631_v13 }
 0x3b9   :  { %v1575_v50 = vpack.c.bf16 %v972_v55, %v971_v61  ;;  %v957_v1 = vadd.f32 %v2045_v22, %v937_v58  ;;  %v1448_v4 = vpop.f32.mrb[42].mxu1 }
 0x3ba   :  { %v974_v59 = vmax.f32 %v958_v41, 0.0  ;;  %v940_v7 = vmul.f32 %v1448_v4, %v1906_v5  ;;  %v900_v9 = vpop.f32.mrb[43].mxu1 }
 0x3bb   :  { %v973_v56 = vmax.f32 %v957_v1, 0.0  ;;  %v939_v11 = vmul.f32 %v900_v9, %v1908_v12 }
 0x3bc   :  { %v960_v0 = vadd.f32 %v2045_v22, %v940_v7 }
 0x3bd   :  { %v1579_v60 = vpack.c.bf16 %v974_v59, %v973_v56  ;;  %v959_v63 = vadd.f32 %v2045_v22, %v939_v11  ;;  %v1451_v15 = vpop.f32.mrb[44].mxu1 }
 0x3be   :  { %v976_v16 = vmax.f32 %v960_v0, 0.0  ;;  %v942_v21 = vmul.f32 %v1451_v15, %v1914_v19  ;;  %v910_v27 = vpop.f32.mrb[45].mxu1 }
 0x3bf   :  { %v975_v28 = vmax.f32 %v959_v63, 0.0  ;;  %v941_v33 = vmul.f32 %v910_v27, %v1916_v30  ;;  %1573 = vmatpush3.bf16.xpose.msk.msra.mxu0 %vm2056_vm4, %v1571_v51 }
 0x3c0   :  { %v962_v5 = vadd.f32 %v2045_v22, %v942_v21  ;;  %1574 = vmatprep.subr.bf16.mxu0 %v1631_v13 }
 0x3c1   :  { %v1583_v12 = vpack.c.bf16 %v976_v16, %v975_v28  ;;  %v961_v34 = vadd.f32 %v2045_v22, %v941_v33  ;;  %v1454_v39 = vpop.f32.mrb[46].mxu1 }
 0x3c2   :  { %v978_v40 = vmax.f32 %v962_v5, 0.0  ;;  %v944_v44 = vmul.f32 %v1454_v39, %v1920_v25  ;;  %v920_v45 = vpop.f32.mrb[47].mxu1  ;;  %v146_v25 = vld [vmem:[%s2116_s3 + $0x38] sm:$0xff] }
 0x3c3   :  { %v977_v19 = vmax.f32 %v961_v34, 0.0  ;;  %v943_v48 = vmul.f32 %v920_v45, %v1922_v43  ;;  %v985_v43 = vpop.permute.xlu0 %984 }
 0x3c4   :  { %v964_v30 = vadd.f32 %v2045_v22, %v944_v44 }
 0x3c5   :  { %v1587_v49 = vpack.c.bf16 %v978_v40, %v977_v19  ;;  %v963_v14 = vadd.f32 %v2045_v22, %v943_v48 }
 0x3c6   :  { %v980_v18 = vmax.f32 %v964_v30, 0.0 }
 0x3c7   :  { %v979_v3 = vmax.f32 %v963_v14, 0.0  ;;  %1577 = vmatpush3.bf16.xpose.msk.msra.mxu0 %vm2056_vm4, %v1575_v50 }
 0x3c8   :  { %1578 = vmatprep.subr.bf16.mxu0 %v1631_v13 }
 0x3c9   :  { %v1591_v2 = vpack.c.bf16 %v980_v18, %v979_v3 }
 0x3cf   :  { %1581 = vmatpush3.bf16.xpose.msk.msra.mxu0 %vm2056_vm4, %v1579_v60 }
 0x3d0   :  { %1582 = vmatprep.subr.bf16.mxu0 %v1631_v13 }
 0x3d7   :  { %1585 = vmatpush3.bf16.xpose.msk.msra.mxu0 %vm2056_vm4, %v1583_v12 }
 0x3d8   :  { %1586 = vmatprep.subr.bf16.mxu0 %v1631_v13 }
 0x3df   :  { %1589 = vmatpush3.bf16.xpose.msk.msra.mxu0 %vm2056_vm4, %v1587_v49 }
 0x3e0   :  { %1590 = vmatprep.subr.bf16.mxu0 %v1631_v13 }
 0x3e7   :  { %1593 = vmatpush3.bf16.xpose.msk.msra.mxu0 %vm2056_vm4, %v1591_v2 }
 0x3ee   :  { %1488 = vmatmul.mubr.msk.f32.vlgmr.msra.gmra.mrb[16].mxu0 %vm574_vm2, %v146_v25 }
 0x4c1   :  { %v1104_v22 = vpop.f32.mrb[16].mxu0 }
 0x4c2   :  { %v1105_v20 = vadd.f32 %v1104_v22, %v985_v43  ;;  %v1489_v24 = vpop.f32.mrb[17].mxu0 }
 0x4c4   :  { %v1108_v29 = vmul.f32 %v1689_v6, %v1105_v20 }
 0x4c6   :  { %1109 = vst [vmem:[%s2121_s5] sm:$0xff] %v1108_v29 }

</bundles_post_ra>
